<compile_context>
chip_gen: v7x
topology: tpu7x:2x2x1
jax: 0.10.0
libtpu: 0.0.40
codegen_flags: <defaults>
</compile_context>

<pallas_src>
import functools

import jax
import jax.numpy as jnp
from jax import lax
from jax.experimental import pallas as pl
from jax.experimental.pallas import tpu as pltpu


FOCAL_CONFIG = {
    "temperature": 0.2,
    "shared_contrastive_loss_weight": 1.0,
    "private_contrastive_loss_weight": 1.0,
    "orthogonality_loss_weight": 0.2,
    "subject_invariant_loss_weight": 1.0,
}
MODALITIES = ["mod_a", "mod_b"]

_CONTRACT_LAST = (((1,), (1,)), ((), ()))  # contract last dim of both operands
_OUT_SUBLANES = 8
_OUT_LANES = 128
_FUSED_DOT_MAX_B = 128   # below this, one fused z.z^T beats 3 quadrant dots


# ----------------------------------------------------------------------------
# In-kernel helpers (operate on loaded f32 values).
# ----------------------------------------------------------------------------
def _row_normalize(x):
    """Row L2-normalize (rsqrt clamp == 1e-8 norm clamp in the reference)."""
    return x * lax.rsqrt(jnp.maximum(jnp.sum(x * x, -1, keepdims=True), 1e-16))


def _ntxent_loss(an, bn, inv_temp):
    """NT-Xent loss for one (e1, e2) pair; inputs already row-normalized [B,H] f32.

    Equivalent to CE with label 0 over [positive, negatives] built from the
    virtual [2B, 2B] cosine-similarity matrix."""
    bsz = an.shape[0]
    n = 2 * bsz
    neg_inf = jnp.float32(-1e30)

    if bsz <= _FUSED_DOT_MAX_B:
        # Small-B path: single MXU push/pop on the sublane-stacked z = [an; bn].
        z = jnp.concatenate([an, bn], axis=0).astype(jnp.bfloat16)       # [2B,H]
        sim = lax.dot_general(z, z, _CONTRACT_LAST,
                              preferred_element_type=jnp.float32) * inv_temp
        row = lax.broadcasted_iota(jnp.int32, (n, n), 0)
        col = lax.broadcasted_iota(jnp.int32, (n, n), 1)
        sim_ns = jnp.where(row == col, neg_inf, sim)     # mask self-similarity
        m = jnp.max(sim_ns, -1, keepdims=True)
        lse = m + jnp.log(jnp.sum(jnp.exp(sim_ns - m), -1, keepdims=True))
        # positives: sim[i, i+B] (i < B) and sim[i, i-B] (i >= B)
        pos_mask = jnp.logical_or(col == row + bsz, col == row - bsz)
        pos_sum = jnp.sum(jnp.where(pos_mask, sim, 0.0))
        return (jnp.sum(lse) - pos_sum) / jnp.float32(n)

    # Large-B path: quadrant form (no s21, no [2B,2B] materialization).
    a16 = an.astype(jnp.bfloat16)
    b16 = bn.astype(jnp.bfloat16)
    s11 = lax.dot_general(a16, a16, _CONTRACT_LAST,
                          preferred_element_type=jnp.float32) * inv_temp
    s12 = lax.dot_general(a16, b16, _CONTRACT_LAST,
                          preferred_element_type=jnp.float32) * inv_temp
    s22 = lax.dot_general(b16, b16, _CONTRACT_LAST,
                          preferred_element_type=jnp.float32) * inv_temp

    row = lax.broadcasted_iota(jnp.int32, (bsz, bsz), 0)
    col = lax.broadcasted_iota(jnp.int32, (bsz, bsz), 1)
    diag = row == col
    s11m = jnp.where(diag, neg_inf, s11)
    s22m = jnp.where(diag, neg_inf, s22)

    # Rows 0..B-1: logits = s11m[i,:] U s12[i,:].
    m1 = jnp.maximum(jnp.max(s11m, -1, keepdims=True),
                     jnp.max(s12, -1, keepdims=True))
    e1 = (jnp.sum(jnp.exp(s11m - m1), -1, keepdims=True)
          + jnp.sum(jnp.exp(s12 - m1), -1, keepdims=True))
    lse1 = m1 + jnp.log(e1)

    # Rows B..2B-1: logits = s12[:,i] U s22m[i,:] (s22m symmetric -> axis-0).
    m2 = jnp.maximum(jnp.max(s12, 0, keepdims=True),
                     jnp.max(s22m, 0, keepdims=True))
    e2 = (jnp.sum(jnp.exp(s12 - m2), 0, keepdims=True)
          + jnp.sum(jnp.exp(s22m - m2), 0, keepdims=True))
    lse2 = m2 + jnp.log(e2)

    diag_sum = jnp.sum(jnp.where(diag, s12, 0.0))   # same diagonal for both halves
    return (jnp.sum(lse1) + jnp.sum(lse2) - 2.0 * diag_sum) / jnp.float32(n)


def _ortho_loss(an, bn):
    """CosineEmbeddingLoss(target=-1, margin=0) on pre-normalized rows."""
    cos = jnp.sum(an * bn, -1, keepdims=True)
    return jnp.mean(jnp.maximum(cos, 0.0))


# ----------------------------------------------------------------------------
# Fused kernel: one step computes all 4 NT-Xent + 6 orthogonality terms,
# weights them and writes one lane-dense (8, 128) output block.
# ----------------------------------------------------------------------------
def _focal_kernel(a1_ref, b1_ref, a2_ref, b2_ref, out_ref, *,
                  half, inv_temp, w_shared, w_private, w_ortho):
    def load_halves_normalized(ref):
        x = ref[...].astype(jnp.float32)
        # NOTE: x[:, half:] is a non-128-aligned lane slice (XLU rotate); free
        # at this size. If D grows, lay inputs out as [B, 2, D/2] upstream.
        return _row_normalize(x[:, :half]), _row_normalize(x[:, half:])

    a1_sh, a1_pr = load_halves_normalized(a1_ref)
    b1_sh, b1_pr = load_halves_normalized(b1_ref)
    a2_sh, a2_pr = load_halves_normalized(a2_ref)
    b2_sh, b2_pr = load_halves_normalized(b2_ref)

    shared = (_ntxent_loss(a1_sh, b1_sh, inv_temp)       # view 1, mod_a vs mod_b
              + _ntxent_loss(a2_sh, b2_sh, inv_temp))    # view 2, mod_a vs mod_b
    private = (_ntxent_loss(a1_pr, a2_pr, inv_temp)      # mod_a, view 1 vs 2
               + _ntxent_loss(b1_pr, b2_pr, inv_temp))   # mod_b, view 1 vs 2
    ortho = (_ortho_loss(a1_sh, a1_pr) + _ortho_loss(a1_pr, b1_pr)
             + _ortho_loss(b1_sh, b1_pr)
             + _ortho_loss(a2_sh, a2_pr) + _ortho_loss(a2_pr, b2_pr)
             + _ortho_loss(b2_sh, b2_pr))

    total = w_shared * shared + w_private * private + w_ortho * ortho
    out_ref[...] = jnp.full(out_ref.shape, total, dtype=out_ref.dtype)


def focal_fused_losses(a1, b1, a2, b2, *, temperature,
                       w_shared, w_private, w_ortho):
    bsz, dim = a1.shape
    half = dim // 2
    kernel = functools.partial(
        _focal_kernel, half=half, inv_temp=1.0 / temperature,
        w_shared=w_shared, w_private=w_private, w_ortho=w_ortho)
    out = pl.pallas_call(
        kernel,
        out_shape=jax.ShapeDtypeStruct((_OUT_SUBLANES, _OUT_LANES), jnp.float32),
        grid=(1,),
        in_specs=[pl.BlockSpec((bsz, dim), lambda i: (0, 0))] * 4,
        out_specs=pl.BlockSpec((_OUT_SUBLANES, _OUT_LANES), lambda i: (0, 0)),
        compiler_params=pltpu.CompilerParams(
            dimension_semantics=("arbitrary",)),
    )(a1, b1, a2, b2)
    return out[0, 0]


# ----------------------------------------------------------------------------
# FOCAL loss forward (thin JAX wrapper around the single fused kernel).
# ----------------------------------------------------------------------------
def focal_loss_forward(mod_features1, mod_features2, subject_invariance_loss,
                       config=FOCAL_CONFIG, modalities=MODALITIES):
    assert len(modalities) == 2, "fused FOCAL kernel assumes the 2-modality setup"
    m_a, m_b = modalities
    contrastive_and_ortho = focal_fused_losses(
        mod_features1[m_a], mod_features1[m_b],
        mod_features2[m_a], mod_features2[m_b],
        temperature=config["temperature"],
        w_shared=config["shared_contrastive_loss_weight"],
        w_private=config["private_contrastive_loss_weight"],
        w_ortho=config["orthogonality_loss_weight"])
    return (contrastive_and_ortho
            + subject_invariance_loss * config["subject_invariant_loss_weight"])


# ----------------------------------------------------------------------------
# Pure-JAX reference (sanity check only).
# ----------------------------------------------------------------------------
def _ref_ntxent(e1, e2, t):
    b = e1.shape[0]
    z = jnp.concatenate([e1, e2], axis=0)
    zn = z / jnp.maximum(jnp.linalg.norm(z, axis=-1, keepdims=True), 1e-8)
    sim = zn @ zn.T / t
    n = 2 * b
    row = jnp.arange(n)[:, None]
    col = jnp.arange(n)[None, :]
    sim_ns = jnp.where(row == col, -1e30, sim)
    lse = jax.scipy.special.logsumexp(sim_ns, axis=-1)
    pos = sim[jnp.arange(n), (jnp.arange(n) + b) % n]
    return jnp.mean(lse - pos)


def _ref_ortho(e1, e2):
    dot = jnp.sum(e1 * e2, -1)
    n1 = jnp.linalg.norm(e1, axis=-1)
    n2 = jnp.linalg.norm(e2, axis=-1)
    return jnp.mean(jnp.maximum(dot / jnp.maximum(n1 * n2, 1e-8), 0.0))


def _ref_focal(mf1, mf2, si, config=FOCAL_CONFIG, modalities=MODALITIES):
    t = config["temperature"]
    sp1 = {m: (f[:, : f.shape[1] // 2], f[:, f.shape[1] // 2:]) for m, f in mf1.items()}
    sp2 = {m: (f[:, : f.shape[1] // 2], f[:, f.shape[1] // 2:]) for m, f in mf2.items()}
    shared = 0.0
    for sp in (sp1, sp2):
        for i, m1 in enumerate(modalities):
            for m2 in modalities[i + 1:]:
                shared += _ref_ntxent(sp[m1][0], sp[m2][0], t)
    private = 0.0
    for m in modalities:
        private += _ref_ntxent(sp1[m][1], sp2[m][1], t)
    ortho = 0.0
    for sp in (sp1, sp2):
        for i, m in enumerate(modalities):
            ortho += _ref_ortho(sp[m][0], sp[m][1])
            for m2 in modalities[i + 1:]:
                ortho += _ref_ortho(sp[m][1], sp[m2][1])
    return (shared * config["shared_contrastive_loss_weight"]
            + private * config["private_contrastive_loss_weight"]
            + ortho * config["orthogonality_loss_weight"]
            + si * config["subject_invariant_loss_weight"])


if __name__ == "__main__":
    key = jax.random.PRNGKey(0)
    B, D = 8, 32  # per-modality feature dim; shared/private halves are 16 each
    keys = jax.random.split(key, 4)

    mod_features1 = {
        "mod_a": jax.random.normal(keys[0], (B, D), dtype=jnp.float32),
        "mod_b": jax.random.normal(keys[1], (B, D), dtype=jnp.float32),
    }
    mod_features2 = {
        "mod_a": jax.random.normal(keys[2], (B, D), dtype=jnp.float32),
        "mod_b": jax.random.normal(keys[3], (B, D), dtype=jnp.float32),
    }
    subject_invariance_loss = jnp.float32(0.1)

    loss = jax.jit(focal_loss_forward)(mod_features1, mod_features2,
                                       subject_invariance_loss)
    jax.block_until_ready(loss)
    assert loss.shape == () and jnp.isfinite(loss)

    ref = _ref_focal(mod_features1, mod_features2, subject_invariance_loss)
    assert jnp.abs(loss - ref) <= 5e-2 * (1.0 + jnp.abs(ref)), (loss, ref)

    print("KERNEL_OK")
</pallas_src>

<mosaic_0001>
module attributes {stable_mosaic.version = 11 : i64} {
  func.func @_focal_kernel(%arg0: i32, %arg1: memref<8x32xf32, #tpu.memory_space<vmem>>, %arg2: memref<8x32xf32, #tpu.memory_space<vmem>>, %arg3: memref<8x32xf32, #tpu.memory_space<vmem>>, %arg4: memref<8x32xf32, #tpu.memory_space<vmem>>, %arg5: memref<8x128xf32, #tpu.memory_space<vmem>>) attributes {dimension_semantics = [#tpu.dimension_semantics<arbitrary>], iteration_bounds = array<i64: 1>, scalar_prefetch = 0 : i64, scratch_operands = 0 : i64, tpu.core_type = #tpu.core_type<tc>, window_params = [{pipeline_mode = #tpu.pipeline_mode<synchronous>, transform_indices = @transform_0, window_bounds = array<i64: 8, 32>}, {pipeline_mode = #tpu.pipeline_mode<synchronous>, transform_indices = @transform_1, window_bounds = array<i64: 8, 32>}, {pipeline_mode = #tpu.pipeline_mode<synchronous>, transform_indices = @transform_2, window_bounds = array<i64: 8, 32>}, {pipeline_mode = #tpu.pipeline_mode<synchronous>, transform_indices = @transform_3, window_bounds = array<i64: 8, 32>}, {pipeline_mode = #tpu.pipeline_mode<synchronous>, transform_indices = @transform_4, window_bounds = array<i64: 8, 128>}]} {
    %c0 = arith.constant 0 : index
    %c0_0 = arith.constant 0 : index
    %0 = vector.load %arg1[%c0, %c0_0] : memref<8x32xf32, #tpu.memory_space<vmem>>, vector<8x32xf32>
    %1 = vector.extract_strided_slice %0 {offsets = [0, 0], sizes = [8, 16], strides = [1, 1]} : vector<8x32xf32> to vector<8x16xf32>
    %2 = arith.mulf %1, %1 : vector<8x16xf32>
    %cst = arith.constant dense<0.000000e+00> : vector<8xf32>
    %3 = vector.multi_reduction <add>, %2, %cst [1] : vector<8x16xf32> to vector<8xf32>
    %4 = vector.shape_cast %3 : vector<8xf32> to vector<8x1xf32>
    %cst_1 = arith.constant 1.000000e-16 : f32
    %5 = vector.broadcast %cst_1 : f32 to vector<8x1xf32>
    %6 = arith.maximumf %4, %5 : vector<8x1xf32>
    %7 = math.rsqrt %6 : vector<8x1xf32>
    %8 = vector.broadcast %7 : vector<8x1xf32> to vector<8x16xf32>
    %9 = arith.mulf %1, %8 : vector<8x16xf32>
    %10 = vector.extract_strided_slice %0 {offsets = [0, 16], sizes = [8, 16], strides = [1, 1]} : vector<8x32xf32> to vector<8x16xf32>
    %11 = arith.mulf %10, %10 : vector<8x16xf32>
    %cst_2 = arith.constant dense<0.000000e+00> : vector<8xf32>
    %12 = vector.multi_reduction <add>, %11, %cst_2 [1] : vector<8x16xf32> to vector<8xf32>
    %13 = vector.shape_cast %12 : vector<8xf32> to vector<8x1xf32>
    %cst_3 = arith.constant 1.000000e-16 : f32
    %14 = vector.broadcast %cst_3 : f32 to vector<8x1xf32>
    %15 = arith.maximumf %13, %14 : vector<8x1xf32>
    %16 = math.rsqrt %15 : vector<8x1xf32>
    %17 = vector.broadcast %16 : vector<8x1xf32> to vector<8x16xf32>
    %18 = arith.mulf %10, %17 : vector<8x16xf32>
    %c0_4 = arith.constant 0 : index
    %c0_5 = arith.constant 0 : index
    %19 = vector.load %arg2[%c0_4, %c0_5] : memref<8x32xf32, #tpu.memory_space<vmem>>, vector<8x32xf32>
    %20 = vector.extract_strided_slice %19 {offsets = [0, 0], sizes = [8, 16], strides = [1, 1]} : vector<8x32xf32> to vector<8x16xf32>
    %21 = arith.mulf %20, %20 : vector<8x16xf32>
    %cst_6 = arith.constant dense<0.000000e+00> : vector<8xf32>
    %22 = vector.multi_reduction <add>, %21, %cst_6 [1] : vector<8x16xf32> to vector<8xf32>
    %23 = vector.shape_cast %22 : vector<8xf32> to vector<8x1xf32>
    %cst_7 = arith.constant 1.000000e-16 : f32
    %24 = vector.broadcast %cst_7 : f32 to vector<8x1xf32>
    %25 = arith.maximumf %23, %24 : vector<8x1xf32>
    %26 = math.rsqrt %25 : vector<8x1xf32>
    %27 = vector.broadcast %26 : vector<8x1xf32> to vector<8x16xf32>
    %28 = arith.mulf %20, %27 : vector<8x16xf32>
    %29 = vector.extract_strided_slice %19 {offsets = [0, 16], sizes = [8, 16], strides = [1, 1]} : vector<8x32xf32> to vector<8x16xf32>
    %30 = arith.mulf %29, %29 : vector<8x16xf32>
    %cst_8 = arith.constant dense<0.000000e+00> : vector<8xf32>
    %31 = vector.multi_reduction <add>, %30, %cst_8 [1] : vector<8x16xf32> to vector<8xf32>
    %32 = vector.shape_cast %31 : vector<8xf32> to vector<8x1xf32>
    %cst_9 = arith.constant 1.000000e-16 : f32
    %33 = vector.broadcast %cst_9 : f32 to vector<8x1xf32>
    %34 = arith.maximumf %32, %33 : vector<8x1xf32>
    %35 = math.rsqrt %34 : vector<8x1xf32>
    %36 = vector.broadcast %35 : vector<8x1xf32> to vector<8x16xf32>
    %37 = arith.mulf %29, %36 : vector<8x16xf32>
    %c0_10 = arith.constant 0 : index
    %c0_11 = arith.constant 0 : index
    %38 = vector.load %arg3[%c0_10, %c0_11] : memref<8x32xf32, #tpu.memory_space<vmem>>, vector<8x32xf32>
    %39 = vector.extract_strided_slice %38 {offsets = [0, 0], sizes = [8, 16], strides = [1, 1]} : vector<8x32xf32> to vector<8x16xf32>
    %40 = arith.mulf %39, %39 : vector<8x16xf32>
    %cst_12 = arith.constant dense<0.000000e+00> : vector<8xf32>
    %41 = vector.multi_reduction <add>, %40, %cst_12 [1] : vector<8x16xf32> to vector<8xf32>
    %42 = vector.shape_cast %41 : vector<8xf32> to vector<8x1xf32>
    %cst_13 = arith.constant 1.000000e-16 : f32
    %43 = vector.broadcast %cst_13 : f32 to vector<8x1xf32>
    %44 = arith.maximumf %42, %43 : vector<8x1xf32>
    %45 = math.rsqrt %44 : vector<8x1xf32>
    %46 = vector.broadcast %45 : vector<8x1xf32> to vector<8x16xf32>
    %47 = arith.mulf %39, %46 : vector<8x16xf32>
    %48 = vector.extract_strided_slice %38 {offsets = [0, 16], sizes = [8, 16], strides = [1, 1]} : vector<8x32xf32> to vector<8x16xf32>
    %49 = arith.mulf %48, %48 : vector<8x16xf32>
    %cst_14 = arith.constant dense<0.000000e+00> : vector<8xf32>
    %50 = vector.multi_reduction <add>, %49, %cst_14 [1] : vector<8x16xf32> to vector<8xf32>
    %51 = vector.shape_cast %50 : vector<8xf32> to vector<8x1xf32>
    %cst_15 = arith.constant 1.000000e-16 : f32
    %52 = vector.broadcast %cst_15 : f32 to vector<8x1xf32>
    %53 = arith.maximumf %51, %52 : vector<8x1xf32>
    %54 = math.rsqrt %53 : vector<8x1xf32>
    %55 = vector.broadcast %54 : vector<8x1xf32> to vector<8x16xf32>
    %56 = arith.mulf %48, %55 : vector<8x16xf32>
    %c0_16 = arith.constant 0 : index
    %c0_17 = arith.constant 0 : index
    %57 = vector.load %arg4[%c0_16, %c0_17] : memref<8x32xf32, #tpu.memory_space<vmem>>, vector<8x32xf32>
    %58 = vector.extract_strided_slice %57 {offsets = [0, 0], sizes = [8, 16], strides = [1, 1]} : vector<8x32xf32> to vector<8x16xf32>
    %59 = arith.mulf %58, %58 : vector<8x16xf32>
    %cst_18 = arith.constant dense<0.000000e+00> : vector<8xf32>
    %60 = vector.multi_reduction <add>, %59, %cst_18 [1] : vector<8x16xf32> to vector<8xf32>
    %61 = vector.shape_cast %60 : vector<8xf32> to vector<8x1xf32>
    %cst_19 = arith.constant 1.000000e-16 : f32
    %62 = vector.broadcast %cst_19 : f32 to vector<8x1xf32>
    %63 = arith.maximumf %61, %62 : vector<8x1xf32>
    %64 = math.rsqrt %63 : vector<8x1xf32>
    %65 = vector.broadcast %64 : vector<8x1xf32> to vector<8x16xf32>
    %66 = arith.mulf %58, %65 : vector<8x16xf32>
    %67 = vector.extract_strided_slice %57 {offsets = [0, 16], sizes = [8, 16], strides = [1, 1]} : vector<8x32xf32> to vector<8x16xf32>
    %68 = arith.mulf %67, %67 : vector<8x16xf32>
    %cst_20 = arith.constant dense<0.000000e+00> : vector<8xf32>
    %69 = vector.multi_reduction <add>, %68, %cst_20 [1] : vector<8x16xf32> to vector<8xf32>
    %70 = vector.shape_cast %69 : vector<8xf32> to vector<8x1xf32>
    %cst_21 = arith.constant 1.000000e-16 : f32
    %71 = vector.broadcast %cst_21 : f32 to vector<8x1xf32>
    %72 = arith.maximumf %70, %71 : vector<8x1xf32>
    %73 = math.rsqrt %72 : vector<8x1xf32>
    %74 = vector.broadcast %73 : vector<8x1xf32> to vector<8x16xf32>
    %75 = arith.mulf %67, %74 : vector<8x16xf32>
    %76 = tpu.concatenate %9, %28 in 0 : vector<8x16xf32>, vector<8x16xf32> -> vector<16x16xf32>
    %77 = arith.truncf %76 : vector<16x16xf32> to vector<16x16xbf16>
    %cst_22 = arith.constant dense<0.000000e+00> : vector<16x16xf32>
    %78 = tpu.matmul %77, %77, %cst_22 {dimension_numbers = #tpu.dot_dimension_numbers<[1], [1], [0], [0], [0, 0, 1, 0], [], []>} : vector<16x16xbf16>, vector<16x16xbf16>, vector<16x16xf32> -> vector<16x16xf32>
    %cst_23 = arith.constant 5.000000e+00 : f32
    %79 = vector.broadcast %cst_23 : f32 to vector<16x16xf32>
    %80 = arith.mulf %78, %79 : vector<16x16xf32>
    %81 = tpu.iota {dimensions = array<i32: 0>} : vector<16x16xi32>
    %82 = tpu.iota {dimensions = array<i32: 1>} : vector<16x16xi32>
    %83 = arith.cmpi eq, %81, %82 : vector<16x16xi32>
    %cst_24 = arith.constant -1.000000e+30 : f32
    %84 = vector.broadcast %cst_24 : f32 to vector<16x16xf32>
    %85 = arith.select %83, %84, %80 : vector<16x16xi1>, vector<16x16xf32>
    %cst_25 = arith.constant dense<0xFF800000> : vector<16xf32>
    %86 = vector.multi_reduction <maximumf>, %85, %cst_25 [1] : vector<16x16xf32> to vector<16xf32>
    %87 = vector.shape_cast %86 : vector<16xf32> to vector<16x1xf32>
    %88 = vector.broadcast %87 : vector<16x1xf32> to vector<16x16xf32>
    %89 = arith.subf %85, %88 : vector<16x16xf32>
    %90 = math.exp %89 : vector<16x16xf32>
    %cst_26 = arith.constant dense<0.000000e+00> : vector<16xf32>
    %91 = vector.multi_reduction <add>, %90, %cst_26 [1] : vector<16x16xf32> to vector<16xf32>
    %92 = vector.shape_cast %91 : vector<16xf32> to vector<16x1xf32>
    %93 = math.log %92 : vector<16x1xf32>
    %94 = arith.addf %87, %93 : vector<16x1xf32>
    %c8_i32 = arith.constant 8 : i32
    %95 = vector.broadcast %c8_i32 : i32 to vector<16x16xi32>
    %96 = arith.addi %81, %95 : vector<16x16xi32>
    %97 = arith.cmpi eq, %82, %96 : vector<16x16xi32>
    %c8_i32_27 = arith.constant 8 : i32
    %98 = vector.broadcast %c8_i32_27 : i32 to vector<16x16xi32>
    %99 = arith.subi %81, %98 : vector<16x16xi32>
    %100 = arith.cmpi eq, %82, %99 : vector<16x16xi32>
    %101 = arith.ori %97, %100 : vector<16x16xi1>
    %cst_28 = arith.constant 0.000000e+00 : f32
    %102 = vector.broadcast %cst_28 : f32 to vector<16x16xf32>
    %103 = arith.select %101, %80, %102 : vector<16x16xi1>, vector<16x16xf32>
    %104 = vector.shape_cast %103 : vector<16x16xf32> to vector<1x16x16xf32>
    %cst_29 = arith.constant dense<0.000000e+00> : vector<1xf32>
    %105 = vector.multi_reduction <add>, %104, %cst_29 [1, 2] : vector<1x16x16xf32> to vector<1xf32>
    %106 = vector.shape_cast %105 : vector<1xf32> to vector<1x1x1xf32>
    %107 = vector.extract %106[0, 0, 0] : f32 from vector<1x1x1xf32>
    %108 = vector.shape_cast %94 : vector<16x1xf32> to vector<1x16x1xf32>
    %cst_30 = arith.constant dense<0.000000e+00> : vector<1xf32>
    %109 = vector.multi_reduction <add>, %108, %cst_30 [1, 2] : vector<1x16x1xf32> to vector<1xf32>
    %110 = vector.shape_cast %109 : vector<1xf32> to vector<1x1x1xf32>
    %111 = vector.extract %110[0, 0, 0] : f32 from vector<1x1x1xf32>
    %112 = arith.subf %111, %107 : f32
    %cst_31 = arith.constant 1.600000e+01 : f32
    %113 = arith.divf %112, %cst_31 : f32
    %114 = tpu.concatenate %47, %66 in 0 : vector<8x16xf32>, vector<8x16xf32> -> vector<16x16xf32>
    %115 = arith.truncf %114 : vector<16x16xf32> to vector<16x16xbf16>
    %cst_32 = arith.constant dense<0.000000e+00> : vector<16x16xf32>
    %116 = tpu.matmul %115, %115, %cst_32 {dimension_numbers = #tpu.dot_dimension_numbers<[1], [1], [0], [0], [0, 0, 1, 0], [], []>} : vector<16x16xbf16>, vector<16x16xbf16>, vector<16x16xf32> -> vector<16x16xf32>
    %cst_33 = arith.constant 5.000000e+00 : f32
    %117 = vector.broadcast %cst_33 : f32 to vector<16x16xf32>
    %118 = arith.mulf %116, %117 : vector<16x16xf32>
    %119 = tpu.iota {dimensions = array<i32: 0>} : vector<16x16xi32>
    %120 = tpu.iota {dimensions = array<i32: 1>} : vector<16x16xi32>
    %121 = arith.cmpi eq, %119, %120 : vector<16x16xi32>
    %cst_34 = arith.constant -1.000000e+30 : f32
    %122 = vector.broadcast %cst_34 : f32 to vector<16x16xf32>
    %123 = arith.select %121, %122, %118 : vector<16x16xi1>, vector<16x16xf32>
    %cst_35 = arith.constant dense<0xFF800000> : vector<16xf32>
    %124 = vector.multi_reduction <maximumf>, %123, %cst_35 [1] : vector<16x16xf32> to vector<16xf32>
    %125 = vector.shape_cast %124 : vector<16xf32> to vector<16x1xf32>
    %126 = vector.broadcast %125 : vector<16x1xf32> to vector<16x16xf32>
    %127 = arith.subf %123, %126 : vector<16x16xf32>
    %128 = math.exp %127 : vector<16x16xf32>
    %cst_36 = arith.constant dense<0.000000e+00> : vector<16xf32>
    %129 = vector.multi_reduction <add>, %128, %cst_36 [1] : vector<16x16xf32> to vector<16xf32>
    %130 = vector.shape_cast %129 : vector<16xf32> to vector<16x1xf32>
    %131 = math.log %130 : vector<16x1xf32>
    %132 = arith.addf %125, %131 : vector<16x1xf32>
    %c8_i32_37 = arith.constant 8 : i32
    %133 = vector.broadcast %c8_i32_37 : i32 to vector<16x16xi32>
    %134 = arith.addi %119, %133 : vector<16x16xi32>
    %135 = arith.cmpi eq, %120, %134 : vector<16x16xi32>
    %c8_i32_38 = arith.constant 8 : i32
    %136 = vector.broadcast %c8_i32_38 : i32 to vector<16x16xi32>
    %137 = arith.subi %119, %136 : vector<16x16xi32>
    %138 = arith.cmpi eq, %120, %137 : vector<16x16xi32>
    %139 = arith.ori %135, %138 : vector<16x16xi1>
    %cst_39 = arith.constant 0.000000e+00 : f32
    %140 = vector.broadcast %cst_39 : f32 to vector<16x16xf32>
    %141 = arith.select %139, %118, %140 : vector<16x16xi1>, vector<16x16xf32>
    %142 = vector.shape_cast %141 : vector<16x16xf32> to vector<1x16x16xf32>
    %cst_40 = arith.constant dense<0.000000e+00> : vector<1xf32>
    %143 = vector.multi_reduction <add>, %142, %cst_40 [1, 2] : vector<1x16x16xf32> to vector<1xf32>
    %144 = vector.shape_cast %143 : vector<1xf32> to vector<1x1x1xf32>
    %145 = vector.extract %144[0, 0, 0] : f32 from vector<1x1x1xf32>
    %146 = vector.shape_cast %132 : vector<16x1xf32> to vector<1x16x1xf32>
    %cst_41 = arith.constant dense<0.000000e+00> : vector<1xf32>
    %147 = vector.multi_reduction <add>, %146, %cst_41 [1, 2] : vector<1x16x1xf32> to vector<1xf32>
    %148 = vector.shape_cast %147 : vector<1xf32> to vector<1x1x1xf32>
    %149 = vector.extract %148[0, 0, 0] : f32 from vector<1x1x1xf32>
    %150 = arith.subf %149, %145 : f32
    %cst_42 = arith.constant 1.600000e+01 : f32
    %151 = arith.divf %150, %cst_42 : f32
    %152 = arith.addf %113, %151 : f32
    %153 = tpu.concatenate %18, %56 in 0 : vector<8x16xf32>, vector<8x16xf32> -> vector<16x16xf32>
    %154 = arith.truncf %153 : vector<16x16xf32> to vector<16x16xbf16>
    %cst_43 = arith.constant dense<0.000000e+00> : vector<16x16xf32>
    %155 = tpu.matmul %154, %154, %cst_43 {dimension_numbers = #tpu.dot_dimension_numbers<[1], [1], [0], [0], [0, 0, 1, 0], [], []>} : vector<16x16xbf16>, vector<16x16xbf16>, vector<16x16xf32> -> vector<16x16xf32>
    %cst_44 = arith.constant 5.000000e+00 : f32
    %156 = vector.broadcast %cst_44 : f32 to vector<16x16xf32>
    %157 = arith.mulf %155, %156 : vector<16x16xf32>
    %158 = tpu.iota {dimensions = array<i32: 0>} : vector<16x16xi32>
    %159 = tpu.iota {dimensions = array<i32: 1>} : vector<16x16xi32>
    %160 = arith.cmpi eq, %158, %159 : vector<16x16xi32>
    %cst_45 = arith.constant -1.000000e+30 : f32
    %161 = vector.broadcast %cst_45 : f32 to vector<16x16xf32>
    %162 = arith.select %160, %161, %157 : vector<16x16xi1>, vector<16x16xf32>
    %cst_46 = arith.constant dense<0xFF800000> : vector<16xf32>
    %163 = vector.multi_reduction <maximumf>, %162, %cst_46 [1] : vector<16x16xf32> to vector<16xf32>
    %164 = vector.shape_cast %163 : vector<16xf32> to vector<16x1xf32>
    %165 = vector.broadcast %164 : vector<16x1xf32> to vector<16x16xf32>
    %166 = arith.subf %162, %165 : vector<16x16xf32>
    %167 = math.exp %166 : vector<16x16xf32>
    %cst_47 = arith.constant dense<0.000000e+00> : vector<16xf32>
    %168 = vector.multi_reduction <add>, %167, %cst_47 [1] : vector<16x16xf32> to vector<16xf32>
    %169 = vector.shape_cast %168 : vector<16xf32> to vector<16x1xf32>
    %170 = math.log %169 : vector<16x1xf32>
    %171 = arith.addf %164, %170 : vector<16x1xf32>
    %c8_i32_48 = arith.constant 8 : i32
    %172 = vector.broadcast %c8_i32_48 : i32 to vector<16x16xi32>
    %173 = arith.addi %158, %172 : vector<16x16xi32>
    %174 = arith.cmpi eq, %159, %173 : vector<16x16xi32>
    %c8_i32_49 = arith.constant 8 : i32
    %175 = vector.broadcast %c8_i32_49 : i32 to vector<16x16xi32>
    %176 = arith.subi %158, %175 : vector<16x16xi32>
    %177 = arith.cmpi eq, %159, %176 : vector<16x16xi32>
    %178 = arith.ori %174, %177 : vector<16x16xi1>
    %cst_50 = arith.constant 0.000000e+00 : f32
    %179 = vector.broadcast %cst_50 : f32 to vector<16x16xf32>
    %180 = arith.select %178, %157, %179 : vector<16x16xi1>, vector<16x16xf32>
    %181 = vector.shape_cast %180 : vector<16x16xf32> to vector<1x16x16xf32>
    %cst_51 = arith.constant dense<0.000000e+00> : vector<1xf32>
    %182 = vector.multi_reduction <add>, %181, %cst_51 [1, 2] : vector<1x16x16xf32> to vector<1xf32>
    %183 = vector.shape_cast %182 : vector<1xf32> to vector<1x1x1xf32>
    %184 = vector.extract %183[0, 0, 0] : f32 from vector<1x1x1xf32>
    %185 = vector.shape_cast %171 : vector<16x1xf32> to vector<1x16x1xf32>
    %cst_52 = arith.constant dense<0.000000e+00> : vector<1xf32>
    %186 = vector.multi_reduction <add>, %185, %cst_52 [1, 2] : vector<1x16x1xf32> to vector<1xf32>
    %187 = vector.shape_cast %186 : vector<1xf32> to vector<1x1x1xf32>
    %188 = vector.extract %187[0, 0, 0] : f32 from vector<1x1x1xf32>
    %189 = arith.subf %188, %184 : f32
    %cst_53 = arith.constant 1.600000e+01 : f32
    %190 = arith.divf %189, %cst_53 : f32
    %191 = tpu.concatenate %37, %75 in 0 : vector<8x16xf32>, vector<8x16xf32> -> vector<16x16xf32>
    %192 = arith.truncf %191 : vector<16x16xf32> to vector<16x16xbf16>
    %cst_54 = arith.constant dense<0.000000e+00> : vector<16x16xf32>
    %193 = tpu.matmul %192, %192, %cst_54 {dimension_numbers = #tpu.dot_dimension_numbers<[1], [1], [0], [0], [0, 0, 1, 0], [], []>} : vector<16x16xbf16>, vector<16x16xbf16>, vector<16x16xf32> -> vector<16x16xf32>
    %cst_55 = arith.constant 5.000000e+00 : f32
    %194 = vector.broadcast %cst_55 : f32 to vector<16x16xf32>
    %195 = arith.mulf %193, %194 : vector<16x16xf32>
    %196 = tpu.iota {dimensions = array<i32: 0>} : vector<16x16xi32>
    %197 = tpu.iota {dimensions = array<i32: 1>} : vector<16x16xi32>
    %198 = arith.cmpi eq, %196, %197 : vector<16x16xi32>
    %cst_56 = arith.constant -1.000000e+30 : f32
    %199 = vector.broadcast %cst_56 : f32 to vector<16x16xf32>
    %200 = arith.select %198, %199, %195 : vector<16x16xi1>, vector<16x16xf32>
    %cst_57 = arith.constant dense<0xFF800000> : vector<16xf32>
    %201 = vector.multi_reduction <maximumf>, %200, %cst_57 [1] : vector<16x16xf32> to vector<16xf32>
    %202 = vector.shape_cast %201 : vector<16xf32> to vector<16x1xf32>
    %203 = vector.broadcast %202 : vector<16x1xf32> to vector<16x16xf32>
    %204 = arith.subf %200, %203 : vector<16x16xf32>
    %205 = math.exp %204 : vector<16x16xf32>
    %cst_58 = arith.constant dense<0.000000e+00> : vector<16xf32>
    %206 = vector.multi_reduction <add>, %205, %cst_58 [1] : vector<16x16xf32> to vector<16xf32>
    %207 = vector.shape_cast %206 : vector<16xf32> to vector<16x1xf32>
    %208 = math.log %207 : vector<16x1xf32>
    %209 = arith.addf %202, %208 : vector<16x1xf32>
    %c8_i32_59 = arith.constant 8 : i32
    %210 = vector.broadcast %c8_i32_59 : i32 to vector<16x16xi32>
    %211 = arith.addi %196, %210 : vector<16x16xi32>
    %212 = arith.cmpi eq, %197, %211 : vector<16x16xi32>
    %c8_i32_60 = arith.constant 8 : i32
    %213 = vector.broadcast %c8_i32_60 : i32 to vector<16x16xi32>
    %214 = arith.subi %196, %213 : vector<16x16xi32>
    %215 = arith.cmpi eq, %197, %214 : vector<16x16xi32>
    %216 = arith.ori %212, %215 : vector<16x16xi1>
    %cst_61 = arith.constant 0.000000e+00 : f32
    %217 = vector.broadcast %cst_61 : f32 to vector<16x16xf32>
    %218 = arith.select %216, %195, %217 : vector<16x16xi1>, vector<16x16xf32>
    %219 = vector.shape_cast %218 : vector<16x16xf32> to vector<1x16x16xf32>
    %cst_62 = arith.constant dense<0.000000e+00> : vector<1xf32>
    %220 = vector.multi_reduction <add>, %219, %cst_62 [1, 2] : vector<1x16x16xf32> to vector<1xf32>
    %221 = vector.shape_cast %220 : vector<1xf32> to vector<1x1x1xf32>
    %222 = vector.extract %221[0, 0, 0] : f32 from vector<1x1x1xf32>
    %223 = vector.shape_cast %209 : vector<16x1xf32> to vector<1x16x1xf32>
    %cst_63 = arith.constant dense<0.000000e+00> : vector<1xf32>
    %224 = vector.multi_reduction <add>, %223, %cst_63 [1, 2] : vector<1x16x1xf32> to vector<1xf32>
    %225 = vector.shape_cast %224 : vector<1xf32> to vector<1x1x1xf32>
    %226 = vector.extract %225[0, 0, 0] : f32 from vector<1x1x1xf32>
    %227 = arith.subf %226, %222 : f32
    %cst_64 = arith.constant 1.600000e+01 : f32
    %228 = arith.divf %227, %cst_64 : f32
    %229 = arith.addf %190, %228 : f32
    %230 = arith.mulf %9, %18 : vector<8x16xf32>
    %cst_65 = arith.constant dense<0.000000e+00> : vector<8xf32>
    %231 = vector.multi_reduction <add>, %230, %cst_65 [1] : vector<8x16xf32> to vector<8xf32>
    %232 = vector.shape_cast %231 : vector<8xf32> to vector<8x1xf32>
    %cst_66 = arith.constant 0.000000e+00 : f32
    %233 = vector.broadcast %cst_66 : f32 to vector<8x1xf32>
    %234 = arith.maximumf %232, %233 : vector<8x1xf32>
    %235 = vector.shape_cast %234 : vector<8x1xf32> to vector<1x8x1xf32>
    %cst_67 = arith.constant dense<0.000000e+00> : vector<1xf32>
    %236 = vector.multi_reduction <add>, %235, %cst_67 [1, 2] : vector<1x8x1xf32> to vector<1xf32>
    %237 = vector.shape_cast %236 : vector<1xf32> to vector<1x1x1xf32>
    %238 = vector.extract %237[0, 0, 0] : f32 from vector<1x1x1xf32>
    %cst_68 = arith.constant 8.000000e+00 : f32
    %239 = arith.divf %238, %cst_68 : f32
    %240 = arith.mulf %18, %37 : vector<8x16xf32>
    %cst_69 = arith.constant dense<0.000000e+00> : vector<8xf32>
    %241 = vector.multi_reduction <add>, %240, %cst_69 [1] : vector<8x16xf32> to vector<8xf32>
    %242 = vector.shape_cast %241 : vector<8xf32> to vector<8x1xf32>
    %cst_70 = arith.constant 0.000000e+00 : f32
    %243 = vector.broadcast %cst_70 : f32 to vector<8x1xf32>
    %244 = arith.maximumf %242, %243 : vector<8x1xf32>
    %245 = vector.shape_cast %244 : vector<8x1xf32> to vector<1x8x1xf32>
    %cst_71 = arith.constant dense<0.000000e+00> : vector<1xf32>
    %246 = vector.multi_reduction <add>, %245, %cst_71 [1, 2] : vector<1x8x1xf32> to vector<1xf32>
    %247 = vector.shape_cast %246 : vector<1xf32> to vector<1x1x1xf32>
    %248 = vector.extract %247[0, 0, 0] : f32 from vector<1x1x1xf32>
    %cst_72 = arith.constant 8.000000e+00 : f32
    %249 = arith.divf %248, %cst_72 : f32
    %250 = arith.addf %239, %249 : f32
    %251 = arith.mulf %28, %37 : vector<8x16xf32>
    %cst_73 = arith.constant dense<0.000000e+00> : vector<8xf32>
    %252 = vector.multi_reduction <add>, %251, %cst_73 [1] : vector<8x16xf32> to vector<8xf32>
    %253 = vector.shape_cast %252 : vector<8xf32> to vector<8x1xf32>
    %cst_74 = arith.constant 0.000000e+00 : f32
    %254 = vector.broadcast %cst_74 : f32 to vector<8x1xf32>
    %255 = arith.maximumf %253, %254 : vector<8x1xf32>
    %256 = vector.shape_cast %255 : vector<8x1xf32> to vector<1x8x1xf32>
    %cst_75 = arith.constant dense<0.000000e+00> : vector<1xf32>
    %257 = vector.multi_reduction <add>, %256, %cst_75 [1, 2] : vector<1x8x1xf32> to vector<1xf32>
    %258 = vector.shape_cast %257 : vector<1xf32> to vector<1x1x1xf32>
    %259 = vector.extract %258[0, 0, 0] : f32 from vector<1x1x1xf32>
    %cst_76 = arith.constant 8.000000e+00 : f32
    %260 = arith.divf %259, %cst_76 : f32
    %261 = arith.addf %250, %260 : f32
    %262 = arith.mulf %47, %56 : vector<8x16xf32>
    %cst_77 = arith.constant dense<0.000000e+00> : vector<8xf32>
    %263 = vector.multi_reduction <add>, %262, %cst_77 [1] : vector<8x16xf32> to vector<8xf32>
    %264 = vector.shape_cast %263 : vector<8xf32> to vector<8x1xf32>
    %cst_78 = arith.constant 0.000000e+00 : f32
    %265 = vector.broadcast %cst_78 : f32 to vector<8x1xf32>
    %266 = arith.maximumf %264, %265 : vector<8x1xf32>
    %267 = vector.shape_cast %266 : vector<8x1xf32> to vector<1x8x1xf32>
    %cst_79 = arith.constant dense<0.000000e+00> : vector<1xf32>
    %268 = vector.multi_reduction <add>, %267, %cst_79 [1, 2] : vector<1x8x1xf32> to vector<1xf32>
    %269 = vector.shape_cast %268 : vector<1xf32> to vector<1x1x1xf32>
    %270 = vector.extract %269[0, 0, 0] : f32 from vector<1x1x1xf32>
    %cst_80 = arith.constant 8.000000e+00 : f32
    %271 = arith.divf %270, %cst_80 : f32
    %272 = arith.addf %261, %271 : f32
    %273 = arith.mulf %56, %75 : vector<8x16xf32>
    %cst_81 = arith.constant dense<0.000000e+00> : vector<8xf32>
    %274 = vector.multi_reduction <add>, %273, %cst_81 [1] : vector<8x16xf32> to vector<8xf32>
    %275 = vector.shape_cast %274 : vector<8xf32> to vector<8x1xf32>
    %cst_82 = arith.constant 0.000000e+00 : f32
    %276 = vector.broadcast %cst_82 : f32 to vector<8x1xf32>
    %277 = arith.maximumf %275, %276 : vector<8x1xf32>
    %278 = vector.shape_cast %277 : vector<8x1xf32> to vector<1x8x1xf32>
    %cst_83 = arith.constant dense<0.000000e+00> : vector<1xf32>
    %279 = vector.multi_reduction <add>, %278, %cst_83 [1, 2] : vector<1x8x1xf32> to vector<1xf32>
    %280 = vector.shape_cast %279 : vector<1xf32> to vector<1x1x1xf32>
    %281 = vector.extract %280[0, 0, 0] : f32 from vector<1x1x1xf32>
    %cst_84 = arith.constant 8.000000e+00 : f32
    %282 = arith.divf %281, %cst_84 : f32
    %283 = arith.addf %272, %282 : f32
    %284 = arith.mulf %66, %75 : vector<8x16xf32>
    %cst_85 = arith.constant dense<0.000000e+00> : vector<8xf32>
    %285 = vector.multi_reduction <add>, %284, %cst_85 [1] : vector<8x16xf32> to vector<8xf32>
    %286 = vector.shape_cast %285 : vector<8xf32> to vector<8x1xf32>
    %cst_86 = arith.constant 0.000000e+00 : f32
    %287 = vector.broadcast %cst_86 : f32 to vector<8x1xf32>
    %288 = arith.maximumf %286, %287 : vector<8x1xf32>
    %289 = vector.shape_cast %288 : vector<8x1xf32> to vector<1x8x1xf32>
    %cst_87 = arith.constant dense<0.000000e+00> : vector<1xf32>
    %290 = vector.multi_reduction <add>, %289, %cst_87 [1, 2] : vector<1x8x1xf32> to vector<1xf32>
    %291 = vector.shape_cast %290 : vector<1xf32> to vector<1x1x1xf32>
    %292 = vector.extract %291[0, 0, 0] : f32 from vector<1x1x1xf32>
    %cst_88 = arith.constant 8.000000e+00 : f32
    %293 = arith.divf %292, %cst_88 : f32
    %294 = arith.addf %283, %293 : f32
    %cst_89 = arith.constant 1.000000e+00 : f32
    %295 = arith.mulf %cst_89, %152 : f32
    %cst_90 = arith.constant 1.000000e+00 : f32
    %296 = arith.mulf %cst_90, %229 : f32
    %297 = arith.addf %295, %296 : f32
    %cst_91 = arith.constant 2.000000e-01 : f32
    %298 = arith.mulf %cst_91, %294 : f32
    %299 = arith.addf %297, %298 : f32
    %300 = vector.broadcast %299 : f32 to vector<8x128xf32>
    %c0_92 = arith.constant 0 : index
    %c0_93 = arith.constant 0 : index
    %301 = vector.load %arg5[%c0_92, %c0_93] : memref<8x128xf32, #tpu.memory_space<vmem>>, vector<8x128xf32>
    tpu.vector_store %arg5[%c0_92, %c0_93], %300 {strides = array<i32>} : memref<8x128xf32, #tpu.memory_space<vmem>>, vector<8x128xf32>,
    return
  }
  func.func @transform_0(%arg0: i32) -> (i32, i32) {
    %c0_i32 = arith.constant 0 : i32
    %c0_i32_0 = arith.constant 0 : i32
    %c0_i32_1 = arith.constant 0 : i32
    return %c0_i32, %c0_i32_0 : i32, i32
  }
  func.func @transform_1(%arg0: i32) -> (i32, i32) {
    %c0_i32 = arith.constant 0 : i32
    %c0_i32_0 = arith.constant 0 : i32
    %c0_i32_1 = arith.constant 0 : i32
    return %c0_i32, %c0_i32_0 : i32, i32
  }
  func.func @transform_2(%arg0: i32) -> (i32, i32) {
    %c0_i32 = arith.constant 0 : i32
    %c0_i32_0 = arith.constant 0 : i32
    %c0_i32_1 = arith.constant 0 : i32
    return %c0_i32, %c0_i32_0 : i32, i32
  }
  func.func @transform_3(%arg0: i32) -> (i32, i32) {
    %c0_i32 = arith.constant 0 : i32
    %c0_i32_0 = arith.constant 0 : i32
    %c0_i32_1 = arith.constant 0 : i32
    return %c0_i32, %c0_i32_0 : i32, i32
  }
  func.func @transform_4(%arg0: i32) -> (i32, i32) {
    %c0_i32 = arith.constant 0 : i32
    %c0_i32_0 = arith.constant 0 : i32
    %c0_i32_1 = arith.constant 0 : i32
    return %c0_i32, %c0_i32_0 : i32, i32
  }
}

</mosaic_0001>

<bundles_post_ra>
// kernel: focal_loss_forward.1
= control target key start
LH: loop header
LB: loop body
LE: loop exit
PB: predicated region body
PF: predicated region fallthrough
CT: control target
= control target key end

     0   :  { %s1242_s0 = inlined_call_operand.vmem [shape: f32[8,32], index: 0, kind: input, shape index: {}]   ;;  %s1243_s1 = inlined_call_operand.hbm [shape: f32[8,32], index: 1, kind: input, shape index: {}]   ;;  %s1244_s2 = inlined_call_operand.hbm [shape: f32[8,32], index: 2, kind: input, shape index: {}]   ;;  %s1245_s3 = inlined_call_operand.hbm [shape: f32[8,32], index: 3, kind: input, shape index: {}]   ;;  %s1246_s4 = inlined_call_operand.vmem [shape: f32[8,128], index: 4, kind: output, shape index: {}]  }
   0x1   :  { %1247 = sst [smem:[#allocation9_spill]] %s1246_s4 }
   0x2   :  { %9 = vsyncpa [#allocation3], 0 }
   0x3   :  { %10 = vsyncpa [#allocation5], 0  ;;  %s899_s15 = smov [#allocation4]   ;;  %s900_s17 = smov [#allocation2]  }
   0x4   :  { %s29_s16 = sshll.u32 %s899_s15, 4  ;;  %s19_s18 = sshll.u32 %s900_s17, 4  ;;  %s30_s16 = int_to_ptr.vmem [resolvable:$true] %s29_s16  ;;  %s20_s18 = int_to_ptr.vmem [resolvable:$true] %s19_s18 }
   0x5   :  { %s829_s21 = scalar_lea.hbm %s1244_s2, 128 }
   0x6   :  { %p830_p0 = scmp.ne.s32.totalorder %s1244_s2, %s829_s21  ;;  %p833_p1 = scmp.lt.u32.totalorder %s829_s21, %s1244_s2 }
   0x8   :  { %p835_p2 = pnand %p833_p1, %p830_p0 }
   0xa   :  { %838 = shalt.err (!%p835_p2)
}
   0xb   :  { %s839_s26 = scalar_lea.vmem %s30_s16, 128  ;;  %p844_p4 = scmp.lt.s32.totalorder %s30_s16, %s30_s16 }
   0xc   :  { %p840_p3 = scmp.ne.s32.totalorder %s30_s16, %s839_s26  ;;  %p845_p5 = scmp.lt.s32.totalorder %s839_s26, %s839_s26 }
   0xe   :  { %p846_p6 = por %p845_p5, %p844_p4 }
  0x10   :  { %p847_p7 = pnand %p846_p6, %p840_p3 }
  0x12   :  { %850 = shalt.err (!%p847_p7)
}
  0x13   :  { %32 = dma.hbm_to_vmem [thread:$0]  %s1244_s2, 128, %s30_s16, [#allocation5]  }
  0x14   :  { %s851_s5 = scalar_lea.hbm %s1243_s1, 128 }
  0x15   :  { %p852_p8 = scmp.ne.s32.totalorder %s1243_s1, %s851_s5  ;;  %p855_p9 = scmp.lt.u32.totalorder %s851_s5, %s1243_s1 }
  0x17   :  { %p857_p10 = pnand %p855_p9, %p852_p8 }
  0x19   :  { %860 = shalt.err (!%p857_p10)
}
  0x1a   :  { %s861_s10 = scalar_lea.vmem %s20_s18, 128  ;;  %p866_p12 = scmp.lt.s32.totalorder %s20_s18, %s20_s18 }
  0x1b   :  { %p862_p11 = scmp.ne.s32.totalorder %s20_s18, %s861_s10  ;;  %p867_p13 = scmp.lt.s32.totalorder %s861_s10, %s861_s10 }
  0x1d   :  { %p868_p0 = por %p867_p13, %p866_p12 }
  0x1f   :  { %p869_p1 = pnand %p868_p0, %p862_p11 }
  0x21   :  { %872 = shalt.err (!%p869_p1)
}
  0x22   :  { %22 = dma.hbm_to_vmem [thread:$0]  %s1243_s1, 128, %s20_s18, [#allocation3]  }
  0x23   :  { %s901_s12 = smov [#allocation6]   ;;  %s873_s16 = scalar_lea.hbm %s1245_s3, 128 }
  0x24   :  { %s39_s13 = sshll.u32 %s901_s12, 4  ;;  %p874_p2 = scmp.ne.s32.totalorder %s1245_s3, %s873_s16  ;;  %s40_s13 = int_to_ptr.vmem [resolvable:$true] %s39_s13 }
  0x25   :  { %p877_p3 = scmp.lt.u32.totalorder %s873_s16, %s1245_s3 }
  0x27   :  { %p879_p4 = pnand %p877_p3, %p874_p2 }
  0x29   :  { %882 = shalt.err (!%p879_p4)
}
  0x2a   :  { %s883_s22 = scalar_lea.vmem %s40_s13, 128  ;;  %p888_p6 = scmp.lt.s32.totalorder %s40_s13, %s40_s13 }
  0x2b   :  { %p884_p5 = scmp.ne.s32.totalorder %s40_s13, %s883_s22  ;;  %p889_p7 = scmp.lt.s32.totalorder %s883_s22, %s883_s22 }
  0x2d   :  { %p890_p8 = por %p889_p7, %p888_p6 }
  0x2f   :  { %p891_p9 = pnand %p890_p8, %p884_p5 }
  0x31   :  { %894 = shalt.err (!%p891_p9)
}
  0x32   :  { %42 = dma.hbm_to_vmem [thread:$0]  %s1245_s3, 128, %s40_s13, [#allocation5]  }
  0x33   :  { %895 = dma.done.wait [#allocation3], 128  }
  0x34   :  { %896 = vsyncadd [#allocation3], 4294967168 }
  0x35   :  { %897 = dma.done.wait [#allocation5], 256  }
  0x36   :  { %898 = vsyncadd [#allocation5], 4294967040  ;;  %v969_v0 = vld [vmem:[%s1242_s0] sm:$0xff]  ;;  %v971_v1 = vld [vmem:[#allocation4] sm:$0xff]  ;;  %s902_s3 = smov 112   ;;  %vm55_vm0 = vcmask 130048   ;;  %v173_v59 = vlaneseq }
  0x37   :  { %v973_v2 = vld [vmem:[#allocation2] sm:$0xff]  ;;  %v54_v3 = vmul.f32 %v969_v0, %v969_v0  ;;  %v91_v4 = vmul.f32 %v971_v1, %v971_v1  ;;  %v979_v5 = vld [vmem:[#allocation6] sm:$0xff]  ;;  %v903_v20 = vmov 0.0   ;;  %vm904_vm1 = vmmov 0  }
  0x38   :  { %v73_v6 = vmul.f32 %v973_v2, %v973_v2  ;;  %v109_v7 = vmul.f32 %v979_v5, %v979_v5  ;;  %723 = vmatprep.subr.bf16.mxu0 %v903_v20  ;;  %729 = vmatprep.subr.bf16.mxu1 %v903_v20  ;;  %v1039_v60 = vshrl.u32 %v173_v59, 7  ;;  %v1044_v62 = vand.u32 127, %v173_v59 }
  0x39   :  { %63 = vrot.lane.b32.xlu0 %v54_v3, %s902_s3  ;;  %99 = vrot.lane.b32.xlu1 %v91_v4, %s902_s3  ;;  %v56_v16 = vsel %vm55_vm0, %v54_v3, 0.0  ;;  %v92_v18 = vsel %vm55_vm0, %v91_v4, 0.0  ;;  %vm228_vm8 = vcmask 7168  }
  0x3a   :  { %v74_v17 = vsel %vm55_vm0, %v73_v6, 0.0  ;;  %v110_v19 = vsel %vm55_vm0, %v109_v7, 0.0  ;;  %725 = vmatprep.mubr.msk.bf16.mxu0 %vm904_vm1, %v903_v20  ;;  %731 = vmatprep.mubr.msk.bf16.mxu1 %vm904_vm1, %v903_v20  ;;  %v1042_v61 = vadd.s32 8, %v1039_v60  ;;  %vm211_vm3 = vcmp.eq.s32.totalorder %v1044_v62, %v1039_v60 }
  0x3b   :  { %vm178_vm6 = vcmp.eq.s32.totalorder %v1039_v60, %v1044_v62 }
  0x3c   :  { %v206_v63 = vadd.s32 8, %v1042_v61  ;;  %vm207_vm2 = vcmp.eq.s32.totalorder %v1044_v62, %v1042_v61  ;;  %vm179_vm7 = vcmp.eq.s32.totalorder %v1042_v61, %v1044_v62 }
  0x3d   :  { %81 = vrot.lane.b32.xlu0 %v73_v6, %s902_s3  ;;  %117 = vrot.lane.b32.xlu1 %v109_v7, %s902_s3 }
  0x3e   :  { %vm208_vm4 = vcmp.eq.s32.totalorder %v1044_v62, %v206_v63 }
  0x3f   :  { %vm1052_vm5 = vmor %vm208_vm4, %vm211_vm3 }
  0xab   :  { %v64_v8 = vpop.permute.xlu0 %63  ;;  %v100_v9 = vpop.permute.xlu1 %99 }
  0xac   :  { %v66_v10 = vsel %vm55_vm0, %v64_v8, 0.0  ;;  %v102_v11 = vsel %vm55_vm0, %v100_v9, 0.0 }
  0xad   :  { %67 = vadd.xlane.f32.xlu0 %v66_v10 }
  0xaf   :  { %v82_v12 = vpop.permute.xlu0 %81  ;;  %v118_v13 = vpop.permute.xlu1 %117 }
  0xb0   :  { %v84_v14 = vsel %vm55_vm0, %v82_v12, 0.0  ;;  %v120_v15 = vsel %vm55_vm0, %v118_v13, 0.0 }
  0xb1   :  { %103 = vadd.xlane.f32.xlu0 %v102_v11  ;;  %85 = vadd.xlane.f32.xlu1 %v84_v14 }
  0xb5   :  { %121 = vadd.xlane.f32.xlu0 %v120_v15  ;;  %57 = vadd.xlane.f32.xlu1 %v56_v16 }
  0xb9   :  { %75 = vadd.xlane.f32.xlu0 %v74_v17  ;;  %93 = vadd.xlane.f32.xlu1 %v92_v18 }
  0xbd   :  { %111 = vadd.xlane.f32.xlu0 %v110_v19 }
 0x13a   :  { %v68_v21 = vpop.xlane.xlu0 %67 }
 0x13b   :  { %v69_v22 = vmax.f32 %v68_v21, 1e-16 }
 0x13d   :  { %781 = vrsqrt.f32 %v69_v22 }
 0x13e   :  { %v86_v23 = vpop.xlane.xlu1 %85  ;;  %v104_v24 = vpop.xlane.xlu0 %103 }
 0x13f   :  { %v87_v25 = vmax.f32 %v86_v23, 1e-16  ;;  %v105_v26 = vmax.f32 %v104_v24, 1e-16 }
 0x141   :  { %783 = vrsqrt.f32 %v105_v26 }
 0x142   :  { %v122_v27 = vpop.xlane.xlu0 %121  ;;  %v58_v28 = vpop.xlane.xlu1 %57  ;;  %785 = vrsqrt.f32 %v87_v25 }
 0x143   :  { %v123_v29 = vmax.f32 %v122_v27, 1e-16  ;;  %v59_v30 = vmax.f32 %v58_v28, 1e-16 }
 0x145   :  { %787 = vrsqrt.f32 %v123_v29 }
 0x146   :  { %v76_v31 = vpop.xlane.xlu0 %75  ;;  %789 = vrsqrt.f32 %v59_v30  ;;  %v94_v32 = vpop.xlane.xlu1 %93 }
 0x147   :  { %v77_v33 = vmax.f32 %v76_v31, 1e-16  ;;  %v95_v34 = vmax.f32 %v94_v32, 1e-16  ;;  %v782_v35 = vpop.eup %781 }
 0x148   :  { %v1000_v40 = vmul.f32 %v782_v35, %v969_v0 }
 0x149   :  { %791 = vrsqrt.f32 %v77_v33 }
 0x14a   :  { %v112_v36 = vpop.xlane.xlu0 %111  ;;  %793 = vrsqrt.f32 %v95_v34 }
 0x14b   :  { %v113_v37 = vmax.f32 %v112_v36, 1e-16  ;;  %v784_v38 = vpop.eup %783 }
 0x14c   :  { %v786_v39 = vpop.eup %785  ;;  %v1003_v41 = vmul.f32 %v784_v38, %v971_v1 }
 0x14d   :  { %795 = vrsqrt.f32 %v113_v37  ;;  %v1008_v45 = vmul.f32 %v786_v39, %v973_v2 }
 0x14e   :  { %v349_v43 = vpack.c.bf16 %v1003_v41, %v1000_v40 }
 0x14f   :  { %v788_v42 = vpop.eup %787 }
 0x150   :  { %v790_v44 = vpop.eup %789  ;;  %v1011_v46 = vmul.f32 %v788_v42, %v979_v5  ;;  %351 = vrot.lane.b32.xlu1 %v349_v43, %s902_s3 }
 0x151   :  { %v1017_v48 = vmul.f32 %v790_v44, %v969_v0 }
 0x152   :  { %v455_v47 = vpack.c.bf16 %v1011_v46, %v1008_v45 }
 0x153   :  { %v792_v49 = vpop.eup %791 }
 0x154   :  { %v794_v50 = vpop.eup %793  ;;  %457 = vrot.lane.b32.xlu0 %v455_v47, %s902_s3  ;;  %v1021_v51 = vmul.f32 %v792_v49, %v973_v2 }
 0x155   :  { %v1026_v53 = vmul.f32 %v794_v50, %v971_v1 }
 0x156   :  { %v126_v52 = vpack.c.bf16 %v1021_v51, %v1017_v48 }
 0x157   :  { %v796_v54 = vpop.eup %795 }
 0x158   :  { %v128_v55 = vsel %vm55_vm0, %v126_v52, 0  ;;  %v1030_v56 = vmul.f32 %v796_v54, %v979_v5 }
 0x159   :  { %724 = vmatpush3.bf16.xpose.msra.mxu0 %v128_v55 }
 0x15a   :  { %v245_v57 = vpack.c.bf16 %v1030_v56, %v1026_v53  ;;  %735 = vmatprep.subr.bf16.mxu0 %v903_v20 }
 0x15c   :  { %v247_v58 = vsel %vm55_vm0, %v245_v57, 0 }
 0x15d   :  { %730 = vmatpush3.bf16.xpose.msra.mxu1 %v247_v58 }
 0x15e   :  { %741 = vmatprep.subr.bf16.mxu1 %v903_v20 }
 0x160   :  { %726 = vmatmul.mubr.msk.bf16.vlgmr.msra.gmra.mrb[0].mxu0 %vm55_vm0, %v126_v52 }
 0x161   :  { %737 = vmatprep.mubr.msk.bf16.mxu0 %vm904_vm1, %v903_v20 }
 0x164   :  { %732 = vmatmul.mubr.msk.bf16.vlgmr.msra.gmra.mrb[0].mxu1 %vm55_vm0, %v245_v57 }
 0x165   :  { %743 = vmatprep.mubr.msk.bf16.mxu1 %vm904_vm1, %v903_v20 }
 0x1c2   :  { %v352_v1 = vpop.permute.xlu1 %351 }
 0x1c3   :  { %v354_v2 = vsel %vm55_vm0, %v352_v1, 0 }
 0x1c4   :  { %736 = vmatpush3.bf16.xpose.msra.mxu0 %v354_v2 }
 0x1c6   :  { %v458_v3 = vpop.permute.xlu0 %457 }
 0x1c7   :  { %v460_v4 = vsel %vm55_vm0, %v458_v3, 0 }
 0x1c8   :  { %742 = vmatpush3.bf16.xpose.msra.mxu1 %v460_v4 }
 0x1cb   :  { %738 = vmatmul.mubr.msk.bf16.vlgmr.msra.gmra.mrb[4].mxu0 %vm55_vm0, %v352_v1 }
 0x1cf   :  { %744 = vmatmul.mubr.msk.bf16.vlgmr.msra.gmra.mrb[4].mxu1 %vm55_vm0, %v458_v3 }
 0x233   :  { %v164_v5 = vpop.f32.mrb[0].mxu0 }
 0x234   :  { %v171_v6 = vmul.f32 5.0, %v164_v5  ;;  %v727_v7 = vpop.f32.mrb[1].mxu0 }
 0x235   :  { %v167_v8 = vpop.f32.mrb[2].mxu0 }
 0x236   :  { %v214_v9 = vsel %vm207_vm2, %v171_v6, 0.0  ;;  %v172_v10 = vmul.f32 5.0, %v167_v8  ;;  %v728_v11 = vpop.f32.mrb[3].mxu0  ;;  %v1070_v12 = vsel %vm178_vm6, -1e+30, %v171_v6 }
 0x237   :  { %v283_v13 = vpop.f32.mrb[0].mxu1  ;;  %v182_v14 = vsel %vm55_vm0, %v1070_v12, -inf  ;;  %v216_v21 = vsel %vm55_vm0, %v214_v9, 0.0 }
 0x238   :  { %v215_v15 = vsel %vm1052_vm5, %v172_v10, 0.0  ;;  %v290_v16 = vmul.f32 5.0, %v283_v13  ;;  %183 = vmax.xlane.f32.xlu1 %v182_v14  ;;  %v733_v17 = vpop.f32.mrb[1].mxu1  ;;  %v181_v18 = vsel %vm179_vm7, -1e+30, %v172_v10 }
 0x239   :  { %v286_v19 = vpop.f32.mrb[2].mxu1  ;;  %v185_v20 = vsel %vm55_vm0, %v181_v18, -inf  ;;  %v217_v22 = vsel %vm55_vm0, %v215_v15, 0.0 }
 0x23a   :  { %v318_v23 = vsel %vm207_vm2, %v290_v16, 0.0  ;;  %v291_v24 = vmul.f32 5.0, %v286_v19  ;;  %186 = vmax.xlane.f32.xlu0 %v185_v20  ;;  %v734_v25 = vpop.f32.mrb[3].mxu1  ;;  %v292_v26 = vsel %vm178_vm6, -1e+30, %v290_v16  ;;  %v1088_v27 = vadd.f32 %v217_v22, %v216_v21 }
 0x23b   :  { %v294_v28 = vsel %vm55_vm0, %v292_v26, -inf  ;;  %v320_v32 = vsel %vm55_vm0, %v318_v23, 0.0 }
 0x23c   :  { %v319_v29 = vsel %vm1052_vm5, %v291_v24, 0.0  ;;  %295 = vmax.xlane.f32.xlu1 %v294_v28  ;;  %v293_v30 = vsel %vm179_vm7, -1e+30, %v291_v24 }
 0x23d   :  { %v297_v31 = vsel %vm55_vm0, %v293_v30, -inf  ;;  %v321_v33 = vsel %vm55_vm0, %v319_v29, 0.0 }
 0x23e   :  { %298 = vmax.xlane.f32.xlu0 %v297_v31  ;;  %v1099_v34 = vadd.f32 %v321_v33, %v320_v32  ;;  %v653_v31 = vmul.f32 %v1011_v46, %v1003_v41 }
 0x29e   :  { %v390_v35 = vpop.f32.mrb[4].mxu0 }
 0x29f   :  { %v397_v36 = vmul.f32 5.0, %v390_v35  ;;  %v739_v37 = vpop.f32.mrb[5].mxu0 }
 0x2a0   :  { %v393_v38 = vpop.f32.mrb[6].mxu0 }
 0x2a1   :  { %v398_v39 = vmul.f32 5.0, %v393_v38  ;;  %v740_v42 = vpop.f32.mrb[7].mxu0  ;;  %v1104_v44 = vsel %vm178_vm6, -1e+30, %v397_v36  ;;  %v425_v47 = vsel %vm207_vm2, %v397_v36, 0.0 }
 0x2a2   :  { %v496_v43 = vpop.f32.mrb[4].mxu1  ;;  %v401_v52 = vsel %vm55_vm0, %v1104_v44, -inf  ;;  %v427_v4 = vsel %vm55_vm0, %v425_v47, 0.0 }
 0x2a3   :  { %v503_v49 = vmul.f32 5.0, %v496_v43  ;;  %v745_v50 = vpop.f32.mrb[5].mxu1  ;;  %v426_v54 = vsel %vm1052_vm5, %v398_v39, 0.0  ;;  %402 = vmax.xlane.f32.xlu1 %v401_v52  ;;  %v1116_v57 = vsel %vm179_vm7, -1e+30, %v398_v39 }
 0x2a4   :  { %v499_v55 = vpop.f32.mrb[6].mxu1  ;;  %v404_v1 = vsel %vm55_vm0, %v1116_v57, -inf  ;;  %v428_v5 = vsel %vm55_vm0, %v426_v54, 0.0 }
 0x2a5   :  { %v531_v58 = vsel %vm207_vm2, %v503_v49, 0.0  ;;  %v504_v59 = vmul.f32 5.0, %v499_v55  ;;  %v746_v63 = vpop.f32.mrb[7].mxu1  ;;  %v1126_v2 = vsel %vm178_vm6, -1e+30, %v503_v49  ;;  %405 = vmax.xlane.f32.xlu0 %v404_v1  ;;  %v429_v8 = vadd.f32 %v428_v5, %v427_v4 }
 0x2a6   :  { %v507_v3 = vsel %vm55_vm0, %v1126_v2, -inf  ;;  %v533_v9 = vsel %vm55_vm0, %v531_v58, 0.0 }
 0x2a7   :  { %v532_v6 = vsel %vm1052_vm5, %v504_v59, 0.0  ;;  %v1137_v7 = vsel %vm179_vm7, -1e+30, %v504_v59  ;;  %508 = vmax.xlane.f32.xlu1 %v507_v3 }
 0x2a8   :  { %v510_v60 = vsel %vm55_vm0, %v1137_v7, -inf  ;;  %v534_v10 = vsel %vm55_vm0, %v532_v6, 0.0 }
 0x2a9   :  { %v535_v11 = vadd.f32 %v534_v10, %v533_v9  ;;  %511 = vmax.xlane.f32.xlu0 %v510_v60 }
 0x2c5   :  { %v1143_v13 = vpop.xlane.xlu1 %183 }
 0x2c6   :  { %v188_v0 = vsub.f32 %v1070_v12, %v1143_v13 }
 0x2c7   :  { %v1147_v14 = vpop.xlane.xlu0 %186 }
 0x2c8   :  { %v190_v61 = vmul.f32 1.442695, %v188_v0  ;;  %v189_v62 = vsub.f32 %v181_v18, %v1147_v14 }
 0x2c9   :  { %v1150_v15 = vpop.xlane.xlu1 %295 }
 0x2ca   :  { %797 = vpow2.f32 %v190_v61  ;;  %v192_v16 = vmul.f32 1.442695, %v189_v62  ;;  %v300_v17 = vsub.f32 %v292_v26, %v1150_v15 }
 0x2cb   :  { %v1153_v19 = vpop.xlane.xlu0 %298 }
 0x2cc   :  { %799 = vpow2.f32 %v192_v16  ;;  %v302_v20 = vmul.f32 1.442695, %v300_v17  ;;  %v301_v21 = vsub.f32 %v293_v30, %v1153_v19  ;;  %v584_v30 = vmul.f32 %v1008_v45, %v1000_v40 }
 0x2ce   :  { %v304_v22 = vmul.f32 1.442695, %v301_v21  ;;  %801 = vpow2.f32 %v302_v20 }
 0x2d0   :  { %803 = vpow2.f32 %v304_v22 }
 0x2d4   :  { %v798_v12 = vpop.eup %797 }
 0x2d5   :  { %v194_v23 = vsel %vm55_vm0, %v798_v12, 0.0 }
 0x2d6   :  { %v800_v24 = vpop.eup %799  ;;  %195 = vadd.xlane.f32.xlu1 %v194_v23 }
 0x2d7   :  { %v197_v18 = vsel %vm55_vm0, %v800_v24, 0.0 }
 0x2d8   :  { %198 = vadd.xlane.f32.xlu0 %v197_v18  ;;  %v802_v25 = vpop.eup %801 }
 0x2d9   :  { %v306_v29 = vsel %vm55_vm0, %v802_v25, 0.0 }
 0x2da   :  { %v804_v28 = vpop.eup %803  ;;  %219 = vadd.xlane.f32.xlu1 %v1088_v27 }
 0x2db   :  { %v309_v26 = vsel %vm55_vm0, %v804_v28, 0.0 }
 0x2dc   :  { %310 = vadd.xlane.f32.xlu0 %v309_v26 }
 0x2de   :  { %307 = vadd.xlane.f32.xlu1 %v306_v29 }
 0x2e2   :  { %323 = vadd.xlane.f32.xlu1 %v1099_v34 }
 0x2f2   :  { %586 = vrot.lane.b32.xlu0 %v584_v30, %s902_s3 }
 0x2f3   :  { %563 = vrot.lane.b32.xlu1 %v1000_v40, %s902_s3 }
 0x2f6   :  { %655 = vrot.lane.b32.xlu0 %v653_v31, %s902_s3 }
 0x2f7   :  { %608 = vrot.lane.b32.xlu1 %v1008_v45, %s902_s3 }
 0x2fb   :  { %631 = vrot.lane.b32.xlu1 %v1003_v41, %s902_s3 }
 0x2ff   :  { %677 = vrot.lane.b32.xlu1 %v1011_v46, %s902_s3 }
 0x315   :  { %430 = vadd.xlane.f32.xlu0 %v429_v8 }
 0x330   :  { %v1176_v27 = vpop.xlane.xlu1 %402 }
 0x331   :  { %v407_v40 = vsub.f32 %v1104_v44, %v1176_v27 }
 0x332   :  { %v1181_v45 = vpop.xlane.xlu0 %405 }
 0x333   :  { %v409_v32 = vmul.f32 1.442695, %v407_v40  ;;  %v408_v58 = vsub.f32 %v1116_v57, %v1181_v45 }
 0x334   :  { %v1183_v35 = vpop.xlane.xlu1 %508 }
 0x335   :  { %805 = vpow2.f32 %v409_v32  ;;  %v513_v44 = vsub.f32 %v1126_v2, %v1183_v35  ;;  %v411_v8 = vmul.f32 1.442695, %v408_v58 }
 0x336   :  { %v1185_v41 = vpop.xlane.xlu0 %511 }
 0x337   :  { %v515_v59 = vmul.f32 1.442695, %v513_v44  ;;  %v514_v60 = vsub.f32 %v1137_v7, %v1185_v41 }
 0x339   :  { %v517_v7 = vmul.f32 1.442695, %v514_v60 }
 0x33f   :  { %v806_v33 = vpop.eup %805 }
 0x340   :  { %v413_v34 = vsel %vm55_vm0, %v806_v33, 0.0 }
 0x341   :  { %414 = vadd.xlane.f32.xlu1 %v413_v34 }
 0x345   :  { %536 = vadd.xlane.f32.xlu1 %v535_v11 }
 0x363   :  { %v196_v46 = vpop.xlane.xlu1 %195 }
 0x364   :  { %807 = vlog2.f32 %v196_v46 }
 0x365   :  { %v199_v36 = vpop.xlane.xlu0 %198 }
 0x366   :  { %809 = vlog2.f32 %v199_v36 }
 0x367   :  { %v220_v37 = vpop.xlane.xlu1 %219 }
 0x368   :  { %v221_v38 = vrot.slane %v220_v37, 4 }
 0x369   :  { %v311_v39 = vpop.xlane.xlu0 %310 }
 0x36a   :  { %v222_v42 = vadd.f32 %v221_v38, %v220_v37  ;;  %811 = vlog2.f32 %v311_v39 }
 0x36b   :  { %v308_v43 = vpop.xlane.xlu1 %307 }
 0x36c   :  { %v223_v47 = vrot.slane %v222_v42, 2  ;;  %813 = vlog2.f32 %v308_v43 }
 0x36d   :  { %815 = vpow2.f32 %v515_v59 }
 0x36e   :  { %v808_v49 = vpop.eup %807  ;;  %v224_v50 = vadd.f32 %v223_v47, %v222_v42  ;;  %817 = vpow2.f32 %v411_v8 }
 0x36f   :  { %v201_v52 = vmul.f32 0.6931472, %v808_v49  ;;  %v1189_v54 = vpop.xlane.xlu1 %323  ;;  %819 = vpow2.f32 %v517_v7 }
 0x370   :  { %v810_v55 = vpop.eup %809  ;;  %v225_v63 = vrot.slane %v224_v50, 1  ;;  %v325_v33 = vrot.slane %v1189_v54, 4 }
 0x371   :  { %v203_v1 = vmul.f32 0.6931472, %v810_v55  ;;  %v204_v3 = vadd.f32 %v201_v52, %v1143_v13 }
 0x372   :  { %v226_v4 = vadd.f32 %v225_v63, %v224_v50  ;;  %v326_v36 = vadd.f32 %v325_v33, %v1189_v54 }
 0x373   :  { %v564_v5 = vpop.permute.xlu1 %563  ;;  %v205_v2 = vadd.f32 %v203_v1, %v1147_v14  ;;  %v229_v10 = vsel %vm228_vm8, %v204_v3, 0.0  ;;  %v587_v14 = vpop.permute.xlu0 %586 }
 0x374   :  { %v812_v6 = vpop.eup %811  ;;  %v566_v9 = vmul.f32 %v564_v5, %v1017_v48  ;;  %747 = vpush %v226_v4  ;;  %v589_v21 = vsel %vm55_vm0, %v587_v14, 0.0  ;;  %v327_v39 = vrot.slane %v326_v36, 2 }
 0x375   :  { %v315_v57 = vmul.f32 0.6931472, %v812_v6  ;;  %v230_v11 = vsel %vm228_vm8, %v205_v2, 0.0 }
 0x376   :  { %v814_v13 = vpop.eup %813  ;;  %v567_v0 = vsel %vm55_vm0, %v566_v9, 0.0  ;;  %v231_v61 = vadd.f32 %v230_v11, %v229_v10  ;;  %v328_v58 = vadd.f32 %v327_v39, %v326_v36 }
 0x377   :  { %v313_v62 = vmul.f32 0.6931472, %v814_v13  ;;  %568 = vadd.xlane.f32.xlu1 %v567_v0  ;;  %v609_v16 = vpop.permute.xlu1 %608  ;;  %v317_v17 = vadd.f32 %v315_v57, %v1153_v19  ;;  %v816_v18 = vpop.eup %815 }
 0x378   :  { %232 = vadd.xlane.f32.xlu0 %v231_v61  ;;  %v611_v20 = vmul.f32 %v609_v16, %v1021_v51  ;;  %v818_v51 = vpop.eup %817  ;;  %v656_v26 = vpop.permute.xlu0 %655  ;;  %v329_v6 = vrot.slane %v328_v58, 1 }
 0x379   :  { %v316_v48 = vadd.f32 %v313_v62, %v1150_v15  ;;  %v333_v23 = vsel %vm228_vm8, %v317_v17, 0.0  ;;  %v519_v15 = vsel %vm55_vm0, %v816_v18, 0.0  ;;  %v416_v29 = vsel %vm55_vm0, %v818_v51, 0.0  ;;  %v820_v30 = vpop.eup %819 }
 0x37a   :  { %v612_v25 = vsel %vm55_vm0, %v611_v20, 0.0  ;;  %v658_v31 = vsel %vm55_vm0, %v656_v26, 0.0  ;;  %v330_v62 = vadd.f32 %v329_v6, %v328_v58 }
 0x37b   :  { %590 = vadd.xlane.f32.xlu1 %v589_v21  ;;  %v632_v22 = vpop.permute.xlu1 %631  ;;  %v332_v12 = vsel %vm228_vm8, %v316_v48, 0.0 }
 0x37c   :  { %v334_v24 = vadd.f32 %v333_v23, %v332_v12  ;;  %v634_v19 = vmul.f32 %v632_v22, %v1026_v53  ;;  %v522_v53 = vsel %vm55_vm0, %v820_v30, 0.0 }
 0x37e   :  { %335 = vadd.xlane.f32.xlu0 %v334_v24  ;;  %v635_v28 = vsel %vm55_vm0, %v634_v19, 0.0 }
 0x37f   :  { %613 = vadd.xlane.f32.xlu1 %v612_v25  ;;  %v1214_v40 = vpop.permute.xlu1 %677 }
 0x382   :  { %520 = vadd.xlane.f32.xlu0 %v519_v15 }
 0x383   :  { %636 = vadd.xlane.f32.xlu1 %v635_v28 }
 0x386   :  { %417 = vadd.xlane.f32.xlu0 %v416_v29 }
 0x387   :  { %659 = vadd.xlane.f32.xlu1 %v658_v31 }
 0x38a   :  { %523 = vadd.xlane.f32.xlu0 %v522_v53 }
 0x3a2   :  { %v431_v34 = vpop.xlane.xlu0 %430 }
 0x3a3   :  { %v432_v37 = vrot.slane %v431_v34, 4 }
 0x3a5   :  { %v433_v47 = vadd.f32 %v432_v37, %v431_v34  ;;  %s748_s0 = spop %747 }
 0x3a7   :  { %v434_v63 = vrot.slane %v433_v47, 2 }
 0x3a9   :  { %v435_v10 = vadd.f32 %v434_v63, %v433_v47 }
 0x3ab   :  { %v436_v7 = vrot.slane %v435_v10, 1 }
 0x3ad   :  { %v437_v22 = vadd.f32 %v436_v7, %v435_v10 }
 0x3ce   :  { %v415_v32 = vpop.xlane.xlu1 %414 }
 0x3cf   :  { %821 = vlog2.f32 %v415_v32  ;;  %v680_v32 = vmul.f32 %v1214_v40, %v1030_v56 }
 0x3d2   :  { %v1217_v46 = vpop.xlane.xlu1 %536 }
 0x3d9   :  { %v822_v12 = vpop.eup %821 }
 0x3da   :  { %v420_v23 = vmul.f32 0.6931472, %v822_v12 }
 0x3dc   :  { %v423_v15 = vadd.f32 %v420_v23, %v1176_v27 }
 0x3de   :  { %v439_v29 = vsel %vm228_vm8, %v423_v15, 0.0 }
 0x404   :  { %v569_v38 = vpop.xlane.xlu1 %568 }
 0x405   :  { %v570_v42 = vmax.f32 %v569_v38, 0.0  ;;  %v233_v43 = vpop.xlane.xlu0 %232  ;;  %v681_v38 = vsel %vm55_vm0, %v680_v32, 0.0 }
 0x406   :  { %v234_v44 = vrot.slane %v233_v43, 4 }
 0x407   :  { %v571_v49 = vsel %vm228_vm8, %v570_v42, 0.0 }
 0x408   :  { %v235_v50 = vadd.f32 %v234_v44, %v233_v43  ;;  %572 = vadd.xlane.f32.xlu0 %v571_v49  ;;  %v591_v52 = vpop.xlane.xlu1 %590 }
 0x409   :  { %v592_v55 = vmax.f32 %v591_v52, 0.0 }
 0x40a   :  { %v236_v59 = vrot.slane %v235_v50, 2 }
 0x40b   :  { %v336_v1 = vpop.xlane.xlu0 %335  ;;  %v593_v3 = vsel %vm228_vm8, %v592_v55, 0.0 }
 0x40c   :  { %v337_v54 = vrot.slane %v336_v1, 4  ;;  %594 = vadd.xlane.f32.xlu0 %v593_v3  ;;  %v614_v4 = vpop.xlane.xlu1 %613  ;;  %v237_v5 = vadd.f32 %v236_v59, %v235_v50 }
 0x40d   :  { %v615_v2 = vmax.f32 %v614_v4, 0.0 }
 0x40e   :  { %v338_v8 = vadd.f32 %v337_v54, %v336_v1  ;;  %v238_v60 = vrot.slane %v237_v5, 1 }
 0x40f   :  { %v521_v9 = vpop.xlane.xlu0 %520  ;;  %v616_v57 = vsel %vm228_vm8, %v615_v2, 0.0 }
 0x410   :  { %v339_v11 = vrot.slane %v338_v8, 2  ;;  %617 = vadd.xlane.f32.xlu0 %v616_v57  ;;  %v637_v13 = vpop.xlane.xlu1 %636  ;;  %v239_v0 = vadd.f32 %v238_v60, %v237_v5  ;;  %823 = vlog2.f32 %v521_v9 }
 0x411   :  { %v638_v61 = vmax.f32 %v637_v13, 0.0 }
 0x412   :  { %749 = vpush %v239_v0  ;;  %v340_v14 = vadd.f32 %v339_v11, %v338_v8 }
 0x413   :  { %751 = vpush %v330_v62  ;;  %v418_v16 = vpop.xlane.xlu0 %417  ;;  %v639_v17 = vsel %vm228_vm8, %v638_v61, 0.0 }
 0x414   :  { %825 = vlog2.f32 %v418_v16  ;;  %640 = vadd.xlane.f32.xlu0 %v639_v17  ;;  %v341_v48 = vrot.slane %v340_v14, 1  ;;  %v660_v34 = vpop.xlane.xlu1 %659 }
 0x415   :  { %v661_v37 = vmax.f32 %v660_v34, 0.0 }
 0x416   :  { %v342_v20 = vadd.f32 %v341_v48, %v340_v14 }
 0x417   :  { %v524_v21 = vpop.xlane.xlu0 %523 }
 0x418   :  { %827 = vlog2.f32 %v524_v21  ;;  %753 = vpush %v342_v20 }
 0x419   :  { %755 = vpush %v437_v22 }
 0x41a   :  { %v824_v24 = vpop.eup %823 }
 0x41b   :  { %v526_v19 = vmul.f32 0.6931472, %v824_v24 }
 0x41d   :  { %v529_v31 = vadd.f32 %v526_v19, %v1183_v35  ;;  %v662_v35 = vsel %vm228_vm8, %v661_v37, 0.0 }
 0x41e   :  { %v826_v18 = vpop.eup %825 }
 0x41f   :  { %v422_v25 = vmul.f32 0.6931472, %v826_v18  ;;  %v545_v27 = vsel %vm228_vm8, %v529_v31, 0.0 }
 0x421   :  { %v424_v51 = vadd.f32 %v422_v25, %v1181_v45 }
 0x422   :  { %v828_v28 = vpop.eup %827 }
 0x423   :  { %v528_v26 = vmul.f32 0.6931472, %v828_v28  ;;  %v440_v30 = vsel %vm228_vm8, %v424_v51, 0.0 }
 0x424   :  { %v441_v53 = vadd.f32 %v440_v30, %v439_v29 }
 0x425   :  { %v530_v33 = vadd.f32 %v528_v26, %v1185_v41  ;;  %v538_v41 = vrot.slane %v1217_v46, 4 }
 0x426   :  { %442 = vadd.xlane.f32.xlu1 %v441_v53 }
 0x427   :  { %v546_v45 = vsel %vm228_vm8, %v530_v33, 0.0  ;;  %v539_v40 = vadd.f32 %v538_v41, %v1217_v46 }
 0x428   :  { %v547_v36 = vadd.f32 %v546_v45, %v545_v27 }
 0x429   :  { %v540_v52 = vrot.slane %v539_v40, 2 }
 0x42a   :  { %682 = vadd.xlane.f32.xlu1 %v681_v38  ;;  %548 = vadd.xlane.f32.xlu0 %v547_v36 }
 0x42b   :  { %v541_v6 = vadd.f32 %v540_v52, %v539_v40 }
 0x42d   :  { %v542_v62 = vrot.slane %v541_v6, 1 }
 0x42e   :  { %663 = vadd.xlane.f32.xlu0 %v662_v35 }
 0x42f   :  { %v543_v24 = vadd.f32 %v542_v62, %v541_v6 }
 0x443   :  { %s750_s25 = spop %749 }
 0x444   :  { %s752_s26 = spop %751  ;;  %s241_s11 = ssub.f32 %s750_s25, %s748_s0 }
 0x446   :  { %s244_s17 = smul.f32 0.0625, %s241_s11 }
 0x449   :  { %s754_s27 = spop %753 }
 0x44a   :  { %s756_s28 = spop %755  ;;  %s344_s12 = ssub.f32 %s754_s27, %s752_s26 }
 0x44c   :  { %s347_s1 = smul.f32 0.0625, %s344_s12 }
 0x495   :  { %v573_v39 = vpop.xlane.xlu0 %572 }
 0x496   :  { %v574_v43 = vrot.slane %v573_v39, 4 }
 0x498   :  { %v575_v55 = vadd.f32 %v574_v43, %v573_v39 }
 0x499   :  { %v595_v42 = vpop.xlane.xlu0 %594 }
 0x49a   :  { %v596_v47 = vrot.slane %v595_v42, 4  ;;  %v576_v4 = vrot.slane %v575_v55, 2 }
 0x49c   :  { %v597_v59 = vadd.f32 %v596_v47, %v595_v42  ;;  %v577_v14 = vadd.f32 %v576_v4, %v575_v55 }
 0x49d   :  { %v618_v56 = vpop.xlane.xlu0 %617 }
 0x49e   :  { %v619_v49 = vrot.slane %v618_v56, 4  ;;  %v598_v8 = vrot.slane %v597_v59, 2  ;;  %v578_v18 = vrot.slane %v577_v14, 1 }
 0x4a0   :  { %v620_v1 = vadd.f32 %v619_v49, %v618_v56  ;;  %v599_v48 = vadd.f32 %v598_v8, %v597_v59  ;;  %v579_v30 = vadd.f32 %v578_v18, %v577_v14 }
 0x4a1   :  { %v641_v44 = vpop.xlane.xlu0 %640 }
 0x4a2   :  { %v642_v50 = vrot.slane %v641_v44, 4  ;;  %v621_v57 = vrot.slane %v620_v1, 2  ;;  %v600_v15 = vrot.slane %v599_v48, 1 }
 0x4a4   :  { %v643_v3 = vadd.f32 %v642_v50, %v641_v44  ;;  %v622_v20 = vadd.f32 %v621_v57, %v620_v1  ;;  %v601_v31 = vadd.f32 %v600_v15, %v599_v48 }
 0x4a6   :  { %v644_v10 = vrot.slane %v643_v3, 2  ;;  %v623_v51 = vrot.slane %v622_v20, 1 }
 0x4a8   :  { %v645_v23 = vadd.f32 %v644_v10, %v643_v3  ;;  %v624_v32 = vadd.f32 %v623_v51, %v622_v20 }
 0x4aa   :  { %v646_v26 = vrot.slane %v645_v23, 1 }
 0x4ac   :  { %v647_v33 = vadd.f32 %v646_v26, %v645_v23 }
 0x4b3   :  { %v443_v58 = vpop.xlane.xlu1 %442 }
 0x4b4   :  { %v444_v63 = vrot.slane %v443_v58, 4 }
 0x4b6   :  { %v445_v54 = vadd.f32 %v444_v63, %v443_v58 }
 0x4b7   :  { %v549_v5 = vpop.xlane.xlu0 %548  ;;  %v683_v2 = vpop.xlane.xlu1 %682 }
 0x4b8   :  { %v446_v60 = vrot.slane %v445_v54, 2  ;;  %v550_v46 = vrot.slane %v549_v5, 4  ;;  %v684_v9 = vmax.f32 %v683_v2, 0.0 }
 0x4ba   :  { %v551_v11 = vadd.f32 %v550_v46, %v549_v5  ;;  %v685_v13 = vsel %vm228_vm8, %v684_v9, 0.0  ;;  %v447_v0 = vadd.f32 %v446_v60, %v445_v54 }
 0x4bb   :  { %v664_v61 = vpop.xlane.xlu0 %663  ;;  %686 = vadd.xlane.f32.xlu0 %v685_v13 }
 0x4bc   :  { %v552_v16 = vrot.slane %v551_v11, 2  ;;  %v665_v17 = vrot.slane %v664_v61, 4  ;;  %v448_v7 = vrot.slane %v447_v0, 1 }
 0x4be   :  { %v666_v21 = vadd.f32 %v665_v17, %v664_v61  ;;  %v449_v22 = vadd.f32 %v448_v7, %v447_v0  ;;  %v553_v12 = vadd.f32 %v552_v16, %v551_v11 }
 0x4c0   :  { %v667_v19 = vrot.slane %v666_v21, 2  ;;  %757 = vpush %v449_v22  ;;  %v554_v25 = vrot.slane %v553_v12, 1 }
 0x4c1   :  { %759 = vpush %v543_v24 }
 0x4c2   :  { %v555_v28 = vadd.f32 %v554_v25, %v553_v12  ;;  %v668_v29 = vadd.f32 %v667_v19, %v666_v21 }
 0x4c4   :  { %761 = vpush %v555_v28  ;;  %v669_v53 = vrot.slane %v668_v29, 1 }
 0x4c5   :  { %763 = vpush %v579_v30 }
 0x4c6   :  { %765 = vpush %v601_v31  ;;  %v670_v34 = vadd.f32 %v669_v53, %v668_v29 }
 0x4c7   :  { %767 = vpush %v624_v32 }
 0x4c8   :  { %769 = vpush %v647_v33 }
 0x4c9   :  { %771 = vpush %v670_v34 }
 0x4f1   :  { %s758_s29 = spop %757 }
 0x4f2   :  { %s760_s30 = spop %759  ;;  %s451_s19 = ssub.f32 %s758_s29, %s756_s28 }
 0x4f3   :  { %s1250_s28 = sld [smem:[#allocation9_spill]] }
 0x4f4   :  { %s454_s23 = smul.f32 0.0625, %s451_s19 }
 0x4f5   :  { %s762_s5 = spop %761 }
 0x4f6   :  { %s764_s6 = spop %763  ;;  %s557_s14 = ssub.f32 %s762_s5, %s760_s30 }
 0x4f7   :  { %s766_s7 = spop %765  ;;  %s583_s8 = smul.f32 0.125, %s764_s6 }
 0x4f8   :  { %s605_s9 = smul.f32 0.125, %s766_s7  ;;  %s768_s10 = spop %767 }
 0x4f9   :  { %s628_s13 = smul.f32 0.125, %s768_s10  ;;  %s770_s15 = spop %769 }
 0x4fa   :  { %s606_s2 = sadd.f32 %s605_s9, %s583_s8  ;;  %s651_s20 = smul.f32 0.125, %s770_s15 }
 0x4fb   :  { %s560_s21 = smul.f32 0.0625, %s557_s14  ;;  %s772_s22 = spop %771 }
 0x4fc   :  { %s629_s16 = sadd.f32 %s628_s13, %s606_s2  ;;  %s674_s24 = smul.f32 0.125, %s772_s22 }
 0x4fd   :  { %s561_s3 = sadd.f32 %s560_s21, %s454_s23 }
 0x4fe   :  { %s652_s18 = sadd.f32 %s651_s20, %s629_s16 }
 0x4ff   :  { %s348_s8 = sadd.f32 %s347_s1, %s244_s17 }
 0x500   :  { %s675_s7 = sadd.f32 %s674_s24, %s652_s18 }
 0x501   :  { %s699_s25 = sadd.f32 %s561_s3, %s348_s8 }
 0x548   :  { %v687_v27 = vpop.xlane.xlu0 %686 }
 0x549   :  { %v688_v45 = vrot.slane %v687_v27, 4 }
 0x54b   :  { %v689_v36 = vadd.f32 %v688_v45, %v687_v27 }
 0x54d   :  { %v690_v37 = vrot.slane %v689_v36, 2 }
 0x54f   :  { %v691_v38 = vadd.f32 %v690_v37, %v689_v36 }
 0x551   :  { %v692_v35 = vrot.slane %v691_v38, 1 }
 0x553   :  { %v693_v39 = vadd.f32 %v692_v35, %v691_v38 }
 0x555   :  { %773 = vpush %v693_v39 }
 0x586   :  { %s774_s6 = spop %773 }
 0x587   :  { %s697_s4 = smul.f32 0.125, %s774_s6 }
 0x589   :  { %s698_s0 = sadd.f32 %s697_s4, %s675_s7 }
 0x58b   :  { %s700_s26 = smul.f32 0.2, %s698_s0 }
 0x58d   :  { %s701_s27 = sadd.f32 %s700_s26, %s699_s25 }
 0x58f   :  { %v702_v42 = vstv %s701_s27 }
 0x590   :  { %703 = vst [vmem:[%s1250_s28] sm:$0xff] %v702_v42 }
 0x591   :  { %708 = vsyncpa [#allocation3], 1 }
 0x592   :  { %709 = vsyncpa [#allocation5], 1 }

</bundles_post_ra>
